<compile_context>
chip_gen: v5e
topology: v5e:2x2
jax: 0.10.0
libtpu: 0.0.40
codegen_flags: <defaults>
</compile_context>

<pallas_src>
import functools

import jax
import jax.numpy as jnp
from jax.experimental import pallas as pl
from jax.experimental.pallas import tpu as pltpu


def _dice_partial_kernel(out_ref, tgt_ref, inter_ref, osum_ref, tsum_ref, *,
                         rows_total, tiles_per_split, n_row_tiles):
    """Accumulate per-class (intersection, pred-sum, target-sum) partial sums.

    Block views (squeezed leading dims dropped):
      out_ref : (C, R, 128) logits, native dtype
      tgt_ref : (C, R, 128) targets, native dtype
      inter_ref / osum_ref / tsum_ref : (C, S, 128) f32 lane-dense accumulators,
        resident across the (arbitrary) row-tile grid axis.
    """
    num_classes, tile_rows, lanes = out_ref.shape
    acc_sub = inter_ref.shape[1]
    tile_id = pl.program_id(2)

    @pl.when(tile_id == 0)
    def _init():
        inter_ref[...] = jnp.zeros_like(inter_ref)
        osum_ref[...] = jnp.zeros_like(osum_ref)
        tsum_ref[...] = jnp.zeros_like(tsum_ref)

    # Channel argmax (first max on ties, matching torch.argmax / jnp.argmax):
    # unrolled running max over class planes -> pure VPU, no XLU reductions.
    best = out_ref[0].astype(jnp.float32)
    best_idx = jnp.zeros((tile_rows, lanes), jnp.int32)
    for c in range(1, num_classes):
        plane = out_ref[c].astype(jnp.float32)
        better = plane > best                 # strict > keeps first-max on ties
        best = jnp.where(better, plane, best)
        best_idx = jnp.where(better, c, best_idx)

    def _fold(x):
        # (R, 128) -> (S, 128) via elementwise vreg adds (groups of 8 rows stay
        # whole vregs, so no cross-lane/sublane XLU traffic).
        if x.shape[0] == acc_sub:
            return x
        return x.reshape(x.shape[0] // acc_sub, acc_sub, lanes).sum(axis=0)

    def _accumulate(valid):
        for c in range(num_classes):
            onehot = (best_idx == c).astype(jnp.float32)
            tgt = tgt_ref[c].astype(jnp.float32)
            if valid is not None:
                # jnp.where (not multiply) so garbage/NaN in OOB rows never leaks.
                onehot = jnp.where(valid, onehot, 0.0)
                tgt = jnp.where(valid, tgt, 0.0)
            inter_ref[c] += _fold(onehot * tgt)
            osum_ref[c] += _fold(onehot)
            tsum_ref[c] += _fold(tgt)

    if rows_total % tile_rows == 0:
        _accumulate(None)                     # aligned: no masking anywhere
    else:
        global_tile = pl.program_id(1) * tiles_per_split + tile_id
        is_edge = global_tile == n_row_tiles - 1

        @pl.when(jnp.logical_not(is_edge))
        def _full_tile():
            _accumulate(None)

        @pl.when(is_edge)
        def _partial_tile():
            row = jax.lax.broadcasted_iota(jnp.int32, (tile_rows, lanes), 0)
            valid = global_tile * tile_rows + row < rows_total
            _accumulate(valid)


def _num_tensorcores():
    """Best-effort TensorCores-per-chip detection (2 on v7x-class parts)."""
    for probe in (lambda: pltpu.get_tpu_info(), lambda: jax.devices()[0]):
        try:
            obj = probe()
        except Exception:
            continue
        for attr in ("num_cores", "tensor_cores_per_chip", "core_count"):
            v = getattr(obj, attr, None)
            if isinstance(v, int) and v > 0:
                return min(v, 2)
    return 1


def dice_metric(outputs, targets, included_class_idxs, *,
                tile_rows=None, num_splits=None):
    """Pallas implementation of DiceMetric.forward.

    outputs: (B, C, H, W) logits (any float dtype; streamed natively)
    targets: (B, C, H, W) one-hot ground truth (streamed natively)
    returns: (len(included_class_idxs),) mean Dice per included class
    """
    B, C, H, W = outputs.shape
    HW = H * W
    LANES = 128
    rows = pl.cdiv(HW, LANES)
    lane_pad = rows * LANES - HW

    # Native-dtype streaming: reshape only (free when HW % 128 == 0; one
    # zero-pad pass otherwise — padded pixels are corrected in the epilogue).
    o = outputs.reshape(B, C, HW)
    t = targets.reshape(B, C, HW)
    if lane_pad:
        o = jnp.pad(o, ((0, 0), (0, 0), (0, lane_pad)))
        t = jnp.pad(t, ((0, 0), (0, 0), (0, lane_pad)))
    o = o.reshape(B, C, rows, LANES)
    t = t.reshape(B, C, rows, LANES)

    # Chip-aware tile sizing: double-buffered inputs get ~35% of physical VMEM,
    # capped at 24 MiB so v7x's 64 MiB/TC budget is respected.
    try:
        vmem_phys = int(pltpu.get_tpu_info().vmem_capacity_bytes)
    except Exception:
        vmem_phys = 64 << 20
    in_bytes_per_row = C * LANES * (o.dtype.itemsize + t.dtype.itemsize)
    budget = min(int(vmem_phys * 0.35), 24 << 20)
    if tile_rows is None:
        tile_rows = (budget // (2 * in_bytes_per_row)) // 8 * 8
    else:
        tile_rows = (tile_rows // 8) * 8
    tile_rows = max(8, tile_rows)
    if tile_rows >= rows:
        tile_rows = rows                      # full-extent block is always legal
    n_tiles = pl.cdiv(rows, tile_rows)

    # HW split so both TensorCores get work when B == 1 (v7x); single-TC parts
    # keep splits == 1 (a split there is only extra init/finalize overhead).
    if num_splits is None:
        num_splits = _num_tensorcores() if B == 1 else 1
    splits = num_splits if (num_splits > 1 and n_tiles % num_splits == 0) else 1
    tiles_per_split = n_tiles // splits

    acc_sub = 8 if tile_rows % 8 == 0 else tile_rows

    kernel = functools.partial(
        _dice_partial_kernel,
        rows_total=rows, tiles_per_split=tiles_per_split, n_row_tiles=n_tiles)

    def in_spec():
        return pl.BlockSpec(
            (None, C, tile_rows, LANES),
            lambda b, s, k: (b, 0, s * tiles_per_split + k, 0))

    def acc_spec():
        return pl.BlockSpec(
            (None, None, C, acc_sub, LANES),
            lambda b, s, k: (b, s, 0, 0, 0))

    acc_shape = jax.ShapeDtypeStruct((B, splits, C, acc_sub, LANES), jnp.float32)

    out_block_bytes = 3 * 2 * C * acc_sub * LANES * 4
    vmem_need = 2 * tile_rows * in_bytes_per_row + out_block_bytes + (2 << 20)
    vmem_limit = int(min(max(vmem_need, 32 << 20), vmem_phys))

    p_inter, p_osum, p_tsum = pl.pallas_call(
        kernel,
        out_shape=(acc_shape, acc_shape, acc_shape),
        grid_spec=pltpu.PrefetchScalarGridSpec(
            num_scalar_prefetch=0,
            grid=(B, splits, tiles_per_split),
            in_specs=[in_spec(), in_spec()],
            out_specs=(acc_spec(), acc_spec(), acc_spec()),
        ),
        compiler_params=pltpu.CompilerParams(
            dimension_semantics=("parallel", "parallel", "arbitrary"),
            vmem_limit_bytes=vmem_limit),
    )(o, t)

    # Tiny JAX epilogue: combine splits + lanes, fix lane-pad over-count,
    # select classes, dice formula, batch mean.
    inter = jnp.sum(p_inter, axis=(1, 3, 4))     # (B, C)
    osum = jnp.sum(p_osum, axis=(1, 3, 4))
    tsum = jnp.sum(p_tsum, axis=(1, 3, 4))
    if lane_pad:
        # Zero-padded pixels deterministically argmax to class 0 (ties -> first
        # index) and have zero targets, so only osum[:, 0] is over-counted.
        osum = osum.at[:, 0].add(-float(lane_pad))
    sel = jnp.asarray(included_class_idxs)
    inter, osum, tsum = inter[:, sel], osum[:, sel], tsum[:, sel]
    dice = 2.0 * inter / (osum + tsum)
    dice = jnp.where((osum == 0.0) & (tsum == 0.0), 1.0, dice)
    dice = jnp.where((osum == 0.0) ^ (tsum == 0.0), 0.0, dice)
    return jnp.mean(dice, axis=0)


def _dice_metric_ref(outputs, targets, included_class_idxs):
    """Pure-JAX reference mirroring the PyTorch module."""
    idx = jnp.argmax(outputs, axis=1)                            # (B, H, W)
    onehot = jax.nn.one_hot(idx, outputs.shape[1], axis=1,
                            dtype=jnp.float32)                   # (B, C, H, W)
    sel = jnp.asarray(included_class_idxs)
    o = onehot[:, sel, ...]
    tg = targets[:, sel, ...].astype(jnp.float32)
    sum_axes = tuple(range(2, o.ndim))
    inter = jnp.sum(o * tg, axis=sum_axes)
    osum = jnp.sum(o, axis=sum_axes)
    tsum = jnp.sum(tg, axis=sum_axes)
    dice = 2.0 * inter / (osum + tsum)
    dice = jnp.where((osum == 0.0) & (tsum == 0.0), 1.0, dice)
    dice = jnp.where((osum == 0.0) ^ (tsum == 0.0), 0.0, dice)
    return jnp.mean(dice, axis=0)


if __name__ == "__main__":
    key = jax.random.PRNGKey(0)
    included_class_idxs = [1, 2, 3]

    # Case 1: module-sized example (B=2, C=4, 16x16) — single full-extent tile.
    B, C, H, W = 2, 4, 16, 16
    k_out, k_tgt = jax.random.split(key)
    outputs = jax.random.normal(k_out, (B, C, H, W), dtype=jnp.float32)
    tgt_labels = jax.random.randint(k_tgt, (B, H, W), 0, C)
    targets = jax.nn.one_hot(tgt_labels, C, axis=1, dtype=jnp.float32)

    dice = dice_metric(outputs, targets, included_class_idxs)
    jax.block_until_ready(dice)
    dice_ref = _dice_metric_ref(outputs, targets, included_class_idxs)
    assert dice.shape == (len(included_class_idxs),)
    assert jnp.allclose(dice, dice_ref, atol=1e-5, rtol=1e-5), (dice, dice_ref)

    # Case 2: tiled rows with a partial (masked) edge tile (rows=18, tile=8).
    o2 = jax.random.normal(jax.random.PRNGKey(1), (1, 4, 48, 48), jnp.float32)
    l2 = jax.random.randint(jax.random.PRNGKey(2), (1, 48, 48), 0, 4)
    t2 = jax.nn.one_hot(l2, 4, axis=1, dtype=jnp.float32)
    d2 = dice_metric(o2, t2, included_class_idxs, tile_rows=8)
    jax.block_until_ready(d2)
    d2_ref = _dice_metric_ref(o2, t2, included_class_idxs)
    assert jnp.allclose(d2, d2_ref, atol=1e-5, rtol=1e-5), (d2, d2_ref)

    # Case 3: HW not a multiple of 128 (10x10) exercises the lane-pad path
    # (class 0 included so the epilogue correction is actually verified).
    o3 = jax.random.normal(jax.random.PRNGKey(3), (2, 4, 10, 10), jnp.float32)
    l3 = jax.random.randint(jax.random.PRNGKey(4), (2, 10, 10), 0, 4)
    t3 = jax.nn.one_hot(l3, 4, axis=1, dtype=jnp.float32)
    d3 = dice_metric(o3, t3, [0, 1, 2, 3])
    jax.block_until_ready(d3)
    d3_ref = _dice_metric_ref(o3, t3, [0, 1, 2, 3])
    assert jnp.allclose(d3, d3_ref, atol=1e-5, rtol=1e-5), (d3, d3_ref)

    print("KERNEL_OK")
</pallas_src>

<mosaic_0001>
module attributes {stable_mosaic.version = 11 : i64} {
  func.func @_dice_partial_kernel(%arg0: i32, %arg1: i32, %arg2: i32, %arg3: memref<1x4x2x128xf32, #tpu.memory_space<vmem>>, %arg4: memref<1x4x2x128xf32, #tpu.memory_space<vmem>>, %arg5: memref<1x1x4x2x128xf32, #tpu.memory_space<vmem>>, %arg6: memref<1x1x4x2x128xf32, #tpu.memory_space<vmem>>, %arg7: memref<1x1x4x2x128xf32, #tpu.memory_space<vmem>>) attributes {dimension_semantics = [#tpu.dimension_semantics<parallel>, #tpu.dimension_semantics<parallel>, #tpu.dimension_semantics<arbitrary>], iteration_bounds = array<i64: 2, 1, 1>, scalar_prefetch = 0 : i64, scratch_operands = 0 : i64, tpu.core_type = #tpu.core_type<tc>, window_params = [{transform_indices = @transform_0, window_bounds = array<i64: 1, 4, 2, 128>}, {transform_indices = @transform_1, window_bounds = array<i64: 1, 4, 2, 128>}, {transform_indices = @transform_2, window_bounds = array<i64: 1, 1, 4, 2, 128>}, {transform_indices = @transform_3, window_bounds = array<i64: 1, 1, 4, 2, 128>}, {transform_indices = @transform_4, window_bounds = array<i64: 1, 1, 4, 2, 128>}]} {
    %c0_i32 = arith.constant 0 : i32
    %0 = arith.cmpi eq, %arg2, %c0_i32 : i32
    %1 = arith.extui %0 : i1 to i32
    %c0_i32_0 = arith.constant 0 : i32
    %2 = arith.cmpi ne, %1, %c0_i32_0 : i32
    scf.if %2 {
      %cst = arith.constant 0.000000e+00 : f32
      %123 = vector.broadcast %cst : f32 to vector<4x2x128xf32>
      %c0_154 = arith.constant 0 : index
      %c0_155 = arith.constant 0 : index
      %c0_156 = arith.constant 0 : index
      %c0_157 = arith.constant 0 : index
      %c0_158 = arith.constant 0 : index
      %124 = vector.load %arg5[%c0_154, %c0_155, %c0_156, %c0_157, %c0_158] : memref<1x1x4x2x128xf32, #tpu.memory_space<vmem>>, vector<1x1x4x2x128xf32>
      %125 = vector.shape_cast %124 : vector<1x1x4x2x128xf32> to vector<4x2x128xf32>
      %126 = vector.shape_cast %123 : vector<4x2x128xf32> to vector<1x1x4x2x128xf32>
      tpu.vector_store %arg5[%c0_154, %c0_155, %c0_156, %c0_157, %c0_158], %126 {strides = array<i32>} : memref<1x1x4x2x128xf32, #tpu.memory_space<vmem>>, vector<1x1x4x2x128xf32>,
      %cst_159 = arith.constant 0.000000e+00 : f32
      %127 = vector.broadcast %cst_159 : f32 to vector<4x2x128xf32>
      %c0_160 = arith.constant 0 : index
      %c0_161 = arith.constant 0 : index
      %c0_162 = arith.constant 0 : index
      %c0_163 = arith.constant 0 : index
      %c0_164 = arith.constant 0 : index
      %128 = vector.load %arg6[%c0_160, %c0_161, %c0_162, %c0_163, %c0_164] : memref<1x1x4x2x128xf32, #tpu.memory_space<vmem>>, vector<1x1x4x2x128xf32>
      %129 = vector.shape_cast %128 : vector<1x1x4x2x128xf32> to vector<4x2x128xf32>
      %130 = vector.shape_cast %127 : vector<4x2x128xf32> to vector<1x1x4x2x128xf32>
      tpu.vector_store %arg6[%c0_160, %c0_161, %c0_162, %c0_163, %c0_164], %130 {strides = array<i32>} : memref<1x1x4x2x128xf32, #tpu.memory_space<vmem>>, vector<1x1x4x2x128xf32>,
      %cst_165 = arith.constant 0.000000e+00 : f32
      %131 = vector.broadcast %cst_165 : f32 to vector<4x2x128xf32>
      %c0_166 = arith.constant 0 : index
      %c0_167 = arith.constant 0 : index
      %c0_168 = arith.constant 0 : index
      %c0_169 = arith.constant 0 : index
      %c0_170 = arith.constant 0 : index
      %132 = vector.load %arg7[%c0_166, %c0_167, %c0_168, %c0_169, %c0_170] : memref<1x1x4x2x128xf32, #tpu.memory_space<vmem>>, vector<1x1x4x2x128xf32>
      %133 = vector.shape_cast %132 : vector<1x1x4x2x128xf32> to vector<4x2x128xf32>
      %134 = vector.shape_cast %131 : vector<4x2x128xf32> to vector<1x1x4x2x128xf32>
      tpu.vector_store %arg7[%c0_166, %c0_167, %c0_168, %c0_169, %c0_170], %134 {strides = array<i32>} : memref<1x1x4x2x128xf32, #tpu.memory_space<vmem>>, vector<1x1x4x2x128xf32>,
    } else {
    }
    %c0 = arith.constant 0 : index
    %c0_1 = arith.constant 0 : index
    %c0_2 = arith.constant 0 : index
    %c0_3 = arith.constant 0 : index
    %3 = vector.load %arg3[%c0, %c0_1, %c0_2, %c0_3] : memref<1x4x2x128xf32, #tpu.memory_space<vmem>>, vector<1x1x2x128xf32>
    %4 = vector.shape_cast %3 : vector<1x1x2x128xf32> to vector<2x128xf32>
    %c0_i32_4 = arith.constant 0 : i32
    %5 = vector.broadcast %c0_i32_4 : i32 to vector<2x128xi32>
    %c0_5 = arith.constant 0 : index
    %c1 = arith.constant 1 : index
    %c0_6 = arith.constant 0 : index
    %c0_7 = arith.constant 0 : index
    %6 = vector.load %arg3[%c0_5, %c1, %c0_6, %c0_7] : memref<1x4x2x128xf32, #tpu.memory_space<vmem>>, vector<1x1x2x128xf32>
    %7 = vector.shape_cast %6 : vector<1x1x2x128xf32> to vector<2x128xf32>
    %8 = arith.cmpf ogt, %7, %4 : vector<2x128xf32>
    %9 = arith.select %8, %7, %4 : vector<2x128xi1>, vector<2x128xf32>
    %c1_i32 = arith.constant 1 : i32
    %10 = vector.broadcast %c1_i32 : i32 to vector<2x128xi32>
    %11 = arith.select %8, %10, %5 : vector<2x128xi1>, vector<2x128xi32>
    %c0_8 = arith.constant 0 : index
    %c2 = arith.constant 2 : index
    %c0_9 = arith.constant 0 : index
    %c0_10 = arith.constant 0 : index
    %12 = vector.load %arg3[%c0_8, %c2, %c0_9, %c0_10] : memref<1x4x2x128xf32, #tpu.memory_space<vmem>>, vector<1x1x2x128xf32>
    %13 = vector.shape_cast %12 : vector<1x1x2x128xf32> to vector<2x128xf32>
    %14 = arith.cmpf ogt, %13, %9 : vector<2x128xf32>
    %15 = arith.select %14, %13, %9 : vector<2x128xi1>, vector<2x128xf32>
    %c2_i32 = arith.constant 2 : i32
    %16 = vector.broadcast %c2_i32 : i32 to vector<2x128xi32>
    %17 = arith.select %14, %16, %11 : vector<2x128xi1>, vector<2x128xi32>
    %c0_11 = arith.constant 0 : index
    %c3 = arith.constant 3 : index
    %c0_12 = arith.constant 0 : index
    %c0_13 = arith.constant 0 : index
    %18 = vector.load %arg3[%c0_11, %c3, %c0_12, %c0_13] : memref<1x4x2x128xf32, #tpu.memory_space<vmem>>, vector<1x1x2x128xf32>
    %19 = vector.shape_cast %18 : vector<1x1x2x128xf32> to vector<2x128xf32>
    %20 = arith.cmpf ogt, %19, %15 : vector<2x128xf32>
    %c3_i32 = arith.constant 3 : i32
    %21 = vector.broadcast %c3_i32 : i32 to vector<2x128xi32>
    %22 = arith.select %20, %21, %17 : vector<2x128xi1>, vector<2x128xi32>
    %c0_i32_14 = arith.constant 0 : i32
    %23 = vector.broadcast %c0_i32_14 : i32 to vector<2x128xi32>
    %24 = arith.cmpi eq, %22, %23 : vector<2x128xi32>
    %25 = arith.extui %24 : vector<2x128xi1> to vector<2x128xi32>
    %26 = arith.sitofp %25 : vector<2x128xi32> to vector<2x128xf32>
    %c0_15 = arith.constant 0 : index
    %c0_16 = arith.constant 0 : index
    %c0_17 = arith.constant 0 : index
    %c0_18 = arith.constant 0 : index
    %27 = vector.load %arg4[%c0_15, %c0_16, %c0_17, %c0_18] : memref<1x4x2x128xf32, #tpu.memory_space<vmem>>, vector<1x1x2x128xf32>
    %28 = vector.shape_cast %27 : vector<1x1x2x128xf32> to vector<2x128xf32>
    %c0_19 = arith.constant 0 : index
    %c0_20 = arith.constant 0 : index
    %c0_21 = arith.constant 0 : index
    %c0_22 = arith.constant 0 : index
    %c0_23 = arith.constant 0 : index
    %29 = vector.load %arg5[%c0_19, %c0_20, %c0_21, %c0_22, %c0_23] : memref<1x1x4x2x128xf32, #tpu.memory_space<vmem>>, vector<1x1x1x2x128xf32>
    %30 = vector.shape_cast %29 : vector<1x1x1x2x128xf32> to vector<2x128xf32>
    %31 = arith.mulf %26, %28 : vector<2x128xf32>
    %32 = arith.addf %30, %31 : vector<2x128xf32>
    %c0_24 = arith.constant 0 : index
    %c0_25 = arith.constant 0 : index
    %c0_26 = arith.constant 0 : index
    %c0_27 = arith.constant 0 : index
    %c0_28 = arith.constant 0 : index
    %33 = vector.load %arg5[%c0_24, %c0_25, %c0_26, %c0_27, %c0_28] : memref<1x1x4x2x128xf32, #tpu.memory_space<vmem>>, vector<1x1x1x2x128xf32>
    %34 = vector.shape_cast %33 : vector<1x1x1x2x128xf32> to vector<2x128xf32>
    %35 = vector.shape_cast %32 : vector<2x128xf32> to vector<1x1x1x2x128xf32>
    tpu.vector_store %arg5[%c0_24, %c0_25, %c0_26, %c0_27, %c0_28], %35 {strides = array<i32>} : memref<1x1x4x2x128xf32, #tpu.memory_space<vmem>>, vector<1x1x1x2x128xf32>,
    %c0_29 = arith.constant 0 : index
    %c0_30 = arith.constant 0 : index
    %c0_31 = arith.constant 0 : index
    %c0_32 = arith.constant 0 : index
    %c0_33 = arith.constant 0 : index
    %36 = vector.load %arg6[%c0_29, %c0_30, %c0_31, %c0_32, %c0_33] : memref<1x1x4x2x128xf32, #tpu.memory_space<vmem>>, vector<1x1x1x2x128xf32>
    %37 = vector.shape_cast %36 : vector<1x1x1x2x128xf32> to vector<2x128xf32>
    %38 = arith.addf %37, %26 : vector<2x128xf32>
    %c0_34 = arith.constant 0 : index
    %c0_35 = arith.constant 0 : index
    %c0_36 = arith.constant 0 : index
    %c0_37 = arith.constant 0 : index
    %c0_38 = arith.constant 0 : index
    %39 = vector.load %arg6[%c0_34, %c0_35, %c0_36, %c0_37, %c0_38] : memref<1x1x4x2x128xf32, #tpu.memory_space<vmem>>, vector<1x1x1x2x128xf32>
    %40 = vector.shape_cast %39 : vector<1x1x1x2x128xf32> to vector<2x128xf32>
    %41 = vector.shape_cast %38 : vector<2x128xf32> to vector<1x1x1x2x128xf32>
    tpu.vector_store %arg6[%c0_34, %c0_35, %c0_36, %c0_37, %c0_38], %41 {strides = array<i32>} : memref<1x1x4x2x128xf32, #tpu.memory_space<vmem>>, vector<1x1x1x2x128xf32>,
    %c0_39 = arith.constant 0 : index
    %c0_40 = arith.constant 0 : index
    %c0_41 = arith.constant 0 : index
    %c0_42 = arith.constant 0 : index
    %c0_43 = arith.constant 0 : index
    %42 = vector.load %arg7[%c0_39, %c0_40, %c0_41, %c0_42, %c0_43] : memref<1x1x4x2x128xf32, #tpu.memory_space<vmem>>, vector<1x1x1x2x128xf32>
    %43 = vector.shape_cast %42 : vector<1x1x1x2x128xf32> to vector<2x128xf32>
    %44 = arith.addf %43, %28 : vector<2x128xf32>
    %c0_44 = arith.constant 0 : index
    %c0_45 = arith.constant 0 : index
    %c0_46 = arith.constant 0 : index
    %c0_47 = arith.constant 0 : index
    %c0_48 = arith.constant 0 : index
    %45 = vector.load %arg7[%c0_44, %c0_45, %c0_46, %c0_47, %c0_48] : memref<1x1x4x2x128xf32, #tpu.memory_space<vmem>>, vector<1x1x1x2x128xf32>
    %46 = vector.shape_cast %45 : vector<1x1x1x2x128xf32> to vector<2x128xf32>
    %47 = vector.shape_cast %44 : vector<2x128xf32> to vector<1x1x1x2x128xf32>
    tpu.vector_store %arg7[%c0_44, %c0_45, %c0_46, %c0_47, %c0_48], %47 {strides = array<i32>} : memref<1x1x4x2x128xf32, #tpu.memory_space<vmem>>, vector<1x1x1x2x128xf32>,
    %c1_i32_49 = arith.constant 1 : i32
    %48 = vector.broadcast %c1_i32_49 : i32 to vector<2x128xi32>
    %49 = arith.cmpi eq, %22, %48 : vector<2x128xi32>
    %50 = arith.extui %49 : vector<2x128xi1> to vector<2x128xi32>
    %51 = arith.sitofp %50 : vector<2x128xi32> to vector<2x128xf32>
    %c0_50 = arith.constant 0 : index
    %c1_51 = arith.constant 1 : index
    %c0_52 = arith.constant 0 : index
    %c0_53 = arith.constant 0 : index
    %52 = vector.load %arg4[%c0_50, %c1_51, %c0_52, %c0_53] : memref<1x4x2x128xf32, #tpu.memory_space<vmem>>, vector<1x1x2x128xf32>
    %53 = vector.shape_cast %52 : vector<1x1x2x128xf32> to vector<2x128xf32>
    %c0_54 = arith.constant 0 : index
    %c0_55 = arith.constant 0 : index
    %c1_56 = arith.constant 1 : index
    %c0_57 = arith.constant 0 : index
    %c0_58 = arith.constant 0 : index
    %54 = vector.load %arg5[%c0_54, %c0_55, %c1_56, %c0_57, %c0_58] : memref<1x1x4x2x128xf32, #tpu.memory_space<vmem>>, vector<1x1x1x2x128xf32>
    %55 = vector.shape_cast %54 : vector<1x1x1x2x128xf32> to vector<2x128xf32>
    %56 = arith.mulf %51, %53 : vector<2x128xf32>
    %57 = arith.addf %55, %56 : vector<2x128xf32>
    %c0_59 = arith.constant 0 : index
    %c0_60 = arith.constant 0 : index
    %c1_61 = arith.constant 1 : index
    %c0_62 = arith.constant 0 : index
    %c0_63 = arith.constant 0 : index
    %58 = vector.load %arg5[%c0_59, %c0_60, %c1_61, %c0_62, %c0_63] : memref<1x1x4x2x128xf32, #tpu.memory_space<vmem>>, vector<1x1x1x2x128xf32>
    %59 = vector.shape_cast %58 : vector<1x1x1x2x128xf32> to vector<2x128xf32>
    %60 = vector.shape_cast %57 : vector<2x128xf32> to vector<1x1x1x2x128xf32>
    tpu.vector_store %arg5[%c0_59, %c0_60, %c1_61, %c0_62, %c0_63], %60 {strides = array<i32>} : memref<1x1x4x2x128xf32, #tpu.memory_space<vmem>>, vector<1x1x1x2x128xf32>,
    %c0_64 = arith.constant 0 : index
    %c0_65 = arith.constant 0 : index
    %c1_66 = arith.constant 1 : index
    %c0_67 = arith.constant 0 : index
    %c0_68 = arith.constant 0 : index
    %61 = vector.load %arg6[%c0_64, %c0_65, %c1_66, %c0_67, %c0_68] : memref<1x1x4x2x128xf32, #tpu.memory_space<vmem>>, vector<1x1x1x2x128xf32>
    %62 = vector.shape_cast %61 : vector<1x1x1x2x128xf32> to vector<2x128xf32>
    %63 = arith.addf %62, %51 : vector<2x128xf32>
    %c0_69 = arith.constant 0 : index
    %c0_70 = arith.constant 0 : index
    %c1_71 = arith.constant 1 : index
    %c0_72 = arith.constant 0 : index
    %c0_73 = arith.constant 0 : index
    %64 = vector.load %arg6[%c0_69, %c0_70, %c1_71, %c0_72, %c0_73] : memref<1x1x4x2x128xf32, #tpu.memory_space<vmem>>, vector<1x1x1x2x128xf32>
    %65 = vector.shape_cast %64 : vector<1x1x1x2x128xf32> to vector<2x128xf32>
    %66 = vector.shape_cast %63 : vector<2x128xf32> to vector<1x1x1x2x128xf32>
    tpu.vector_store %arg6[%c0_69, %c0_70, %c1_71, %c0_72, %c0_73], %66 {strides = array<i32>} : memref<1x1x4x2x128xf32, #tpu.memory_space<vmem>>, vector<1x1x1x2x128xf32>,
    %c0_74 = arith.constant 0 : index
    %c0_75 = arith.constant 0 : index
    %c1_76 = arith.constant 1 : index
    %c0_77 = arith.constant 0 : index
    %c0_78 = arith.constant 0 : index
    %67 = vector.load %arg7[%c0_74, %c0_75, %c1_76, %c0_77, %c0_78] : memref<1x1x4x2x128xf32, #tpu.memory_space<vmem>>, vector<1x1x1x2x128xf32>
    %68 = vector.shape_cast %67 : vector<1x1x1x2x128xf32> to vector<2x128xf32>
    %69 = arith.addf %68, %53 : vector<2x128xf32>
    %c0_79 = arith.constant 0 : index
    %c0_80 = arith.constant 0 : index
    %c1_81 = arith.constant 1 : index
    %c0_82 = arith.constant 0 : index
    %c0_83 = arith.constant 0 : index
    %70 = vector.load %arg7[%c0_79, %c0_80, %c1_81, %c0_82, %c0_83] : memref<1x1x4x2x128xf32, #tpu.memory_space<vmem>>, vector<1x1x1x2x128xf32>
    %71 = vector.shape_cast %70 : vector<1x1x1x2x128xf32> to vector<2x128xf32>
    %72 = vector.shape_cast %69 : vector<2x128xf32> to vector<1x1x1x2x128xf32>
    tpu.vector_store %arg7[%c0_79, %c0_80, %c1_81, %c0_82, %c0_83], %72 {strides = array<i32>} : memref<1x1x4x2x128xf32, #tpu.memory_space<vmem>>, vector<1x1x1x2x128xf32>,
    %c2_i32_84 = arith.constant 2 : i32
    %73 = vector.broadcast %c2_i32_84 : i32 to vector<2x128xi32>
    %74 = arith.cmpi eq, %22, %73 : vector<2x128xi32>
    %75 = arith.extui %74 : vector<2x128xi1> to vector<2x128xi32>
    %76 = arith.sitofp %75 : vector<2x128xi32> to vector<2x128xf32>
    %c0_85 = arith.constant 0 : index
    %c2_86 = arith.constant 2 : index
    %c0_87 = arith.constant 0 : index
    %c0_88 = arith.constant 0 : index
    %77 = vector.load %arg4[%c0_85, %c2_86, %c0_87, %c0_88] : memref<1x4x2x128xf32, #tpu.memory_space<vmem>>, vector<1x1x2x128xf32>
    %78 = vector.shape_cast %77 : vector<1x1x2x128xf32> to vector<2x128xf32>
    %c0_89 = arith.constant 0 : index
    %c0_90 = arith.constant 0 : index
    %c2_91 = arith.constant 2 : index
    %c0_92 = arith.constant 0 : index
    %c0_93 = arith.constant 0 : index
    %79 = vector.load %arg5[%c0_89, %c0_90, %c2_91, %c0_92, %c0_93] : memref<1x1x4x2x128xf32, #tpu.memory_space<vmem>>, vector<1x1x1x2x128xf32>
    %80 = vector.shape_cast %79 : vector<1x1x1x2x128xf32> to vector<2x128xf32>
    %81 = arith.mulf %76, %78 : vector<2x128xf32>
    %82 = arith.addf %80, %81 : vector<2x128xf32>
    %c0_94 = arith.constant 0 : index
    %c0_95 = arith.constant 0 : index
    %c2_96 = arith.constant 2 : index
    %c0_97 = arith.constant 0 : index
    %c0_98 = arith.constant 0 : index
    %83 = vector.load %arg5[%c0_94, %c0_95, %c2_96, %c0_97, %c0_98] : memref<1x1x4x2x128xf32, #tpu.memory_space<vmem>>, vector<1x1x1x2x128xf32>
    %84 = vector.shape_cast %83 : vector<1x1x1x2x128xf32> to vector<2x128xf32>
    %85 = vector.shape_cast %82 : vector<2x128xf32> to vector<1x1x1x2x128xf32>
    tpu.vector_store %arg5[%c0_94, %c0_95, %c2_96, %c0_97, %c0_98], %85 {strides = array<i32>} : memref<1x1x4x2x128xf32, #tpu.memory_space<vmem>>, vector<1x1x1x2x128xf32>,
    %c0_99 = arith.constant 0 : index
    %c0_100 = arith.constant 0 : index
    %c2_101 = arith.constant 2 : index
    %c0_102 = arith.constant 0 : index
    %c0_103 = arith.constant 0 : index
    %86 = vector.load %arg6[%c0_99, %c0_100, %c2_101, %c0_102, %c0_103] : memref<1x1x4x2x128xf32, #tpu.memory_space<vmem>>, vector<1x1x1x2x128xf32>
    %87 = vector.shape_cast %86 : vector<1x1x1x2x128xf32> to vector<2x128xf32>
    %88 = arith.addf %87, %76 : vector<2x128xf32>
    %c0_104 = arith.constant 0 : index
    %c0_105 = arith.constant 0 : index
    %c2_106 = arith.constant 2 : index
    %c0_107 = arith.constant 0 : index
    %c0_108 = arith.constant 0 : index
    %89 = vector.load %arg6[%c0_104, %c0_105, %c2_106, %c0_107, %c0_108] : memref<1x1x4x2x128xf32, #tpu.memory_space<vmem>>, vector<1x1x1x2x128xf32>
    %90 = vector.shape_cast %89 : vector<1x1x1x2x128xf32> to vector<2x128xf32>
    %91 = vector.shape_cast %88 : vector<2x128xf32> to vector<1x1x1x2x128xf32>
    tpu.vector_store %arg6[%c0_104, %c0_105, %c2_106, %c0_107, %c0_108], %91 {strides = array<i32>} : memref<1x1x4x2x128xf32, #tpu.memory_space<vmem>>, vector<1x1x1x2x128xf32>,
    %c0_109 = arith.constant 0 : index
    %c0_110 = arith.constant 0 : index
    %c2_111 = arith.constant 2 : index
    %c0_112 = arith.constant 0 : index
    %c0_113 = arith.constant 0 : index
    %92 = vector.load %arg7[%c0_109, %c0_110, %c2_111, %c0_112, %c0_113] : memref<1x1x4x2x128xf32, #tpu.memory_space<vmem>>, vector<1x1x1x2x128xf32>
    %93 = vector.shape_cast %92 : vector<1x1x1x2x128xf32> to vector<2x128xf32>
    %94 = arith.addf %93, %78 : vector<2x128xf32>
    %c0_114 = arith.constant 0 : index
    %c0_115 = arith.constant 0 : index
    %c2_116 = arith.constant 2 : index
    %c0_117 = arith.constant 0 : index
    %c0_118 = arith.constant 0 : index
    %95 = vector.load %arg7[%c0_114, %c0_115, %c2_116, %c0_117, %c0_118] : memref<1x1x4x2x128xf32, #tpu.memory_space<vmem>>, vector<1x1x1x2x128xf32>
    %96 = vector.shape_cast %95 : vector<1x1x1x2x128xf32> to vector<2x128xf32>
    %97 = vector.shape_cast %94 : vector<2x128xf32> to vector<1x1x1x2x128xf32>
    tpu.vector_store %arg7[%c0_114, %c0_115, %c2_116, %c0_117, %c0_118], %97 {strides = array<i32>} : memref<1x1x4x2x128xf32, #tpu.memory_space<vmem>>, vector<1x1x1x2x128xf32>,
    %c3_i32_119 = arith.constant 3 : i32
    %98 = vector.broadcast %c3_i32_119 : i32 to vector<2x128xi32>
    %99 = arith.cmpi eq, %22, %98 : vector<2x128xi32>
    %100 = arith.extui %99 : vector<2x128xi1> to vector<2x128xi32>
    %101 = arith.sitofp %100 : vector<2x128xi32> to vector<2x128xf32>
    %c0_120 = arith.constant 0 : index
    %c3_121 = arith.constant 3 : index
    %c0_122 = arith.constant 0 : index
    %c0_123 = arith.constant 0 : index
    %102 = vector.load %arg4[%c0_120, %c3_121, %c0_122, %c0_123] : memref<1x4x2x128xf32, #tpu.memory_space<vmem>>, vector<1x1x2x128xf32>
    %103 = vector.shape_cast %102 : vector<1x1x2x128xf32> to vector<2x128xf32>
    %c0_124 = arith.constant 0 : index
    %c0_125 = arith.constant 0 : index
    %c3_126 = arith.constant 3 : index
    %c0_127 = arith.constant 0 : index
    %c0_128 = arith.constant 0 : index
    %104 = vector.load %arg5[%c0_124, %c0_125, %c3_126, %c0_127, %c0_128] : memref<1x1x4x2x128xf32, #tpu.memory_space<vmem>>, vector<1x1x1x2x128xf32>
    %105 = vector.shape_cast %104 : vector<1x1x1x2x128xf32> to vector<2x128xf32>
    %106 = arith.mulf %101, %103 : vector<2x128xf32>
    %107 = arith.addf %105, %106 : vector<2x128xf32>
    %c0_129 = arith.constant 0 : index
    %c0_130 = arith.constant 0 : index
    %c3_131 = arith.constant 3 : index
    %c0_132 = arith.constant 0 : index
    %c0_133 = arith.constant 0 : index
    %108 = vector.load %arg5[%c0_129, %c0_130, %c3_131, %c0_132, %c0_133] : memref<1x1x4x2x128xf32, #tpu.memory_space<vmem>>, vector<1x1x1x2x128xf32>
    %109 = vector.shape_cast %108 : vector<1x1x1x2x128xf32> to vector<2x128xf32>
    %110 = vector.shape_cast %107 : vector<2x128xf32> to vector<1x1x1x2x128xf32>
    tpu.vector_store %arg5[%c0_129, %c0_130, %c3_131, %c0_132, %c0_133], %110 {strides = array<i32>} : memref<1x1x4x2x128xf32, #tpu.memory_space<vmem>>, vector<1x1x1x2x128xf32>,
    %c0_134 = arith.constant 0 : index
    %c0_135 = arith.constant 0 : index
    %c3_136 = arith.constant 3 : index
    %c0_137 = arith.constant 0 : index
    %c0_138 = arith.constant 0 : index
    %111 = vector.load %arg6[%c0_134, %c0_135, %c3_136, %c0_137, %c0_138] : memref<1x1x4x2x128xf32, #tpu.memory_space<vmem>>, vector<1x1x1x2x128xf32>
    %112 = vector.shape_cast %111 : vector<1x1x1x2x128xf32> to vector<2x128xf32>
    %113 = arith.addf %112, %101 : vector<2x128xf32>
    %c0_139 = arith.constant 0 : index
    %c0_140 = arith.constant 0 : index
    %c3_141 = arith.constant 3 : index
    %c0_142 = arith.constant 0 : index
    %c0_143 = arith.constant 0 : index
    %114 = vector.load %arg6[%c0_139, %c0_140, %c3_141, %c0_142, %c0_143] : memref<1x1x4x2x128xf32, #tpu.memory_space<vmem>>, vector<1x1x1x2x128xf32>
    %115 = vector.shape_cast %114 : vector<1x1x1x2x128xf32> to vector<2x128xf32>
    %116 = vector.shape_cast %113 : vector<2x128xf32> to vector<1x1x1x2x128xf32>
    tpu.vector_store %arg6[%c0_139, %c0_140, %c3_141, %c0_142, %c0_143], %116 {strides = array<i32>} : memref<1x1x4x2x128xf32, #tpu.memory_space<vmem>>, vector<1x1x1x2x128xf32>,
    %c0_144 = arith.constant 0 : index
    %c0_145 = arith.constant 0 : index
    %c3_146 = arith.constant 3 : index
    %c0_147 = arith.constant 0 : index
    %c0_148 = arith.constant 0 : index
    %117 = vector.load %arg7[%c0_144, %c0_145, %c3_146, %c0_147, %c0_148] : memref<1x1x4x2x128xf32, #tpu.memory_space<vmem>>, vector<1x1x1x2x128xf32>
    %118 = vector.shape_cast %117 : vector<1x1x1x2x128xf32> to vector<2x128xf32>
    %119 = arith.addf %118, %103 : vector<2x128xf32>
    %c0_149 = arith.constant 0 : index
    %c0_150 = arith.constant 0 : index
    %c3_151 = arith.constant 3 : index
    %c0_152 = arith.constant 0 : index
    %c0_153 = arith.constant 0 : index
    %120 = vector.load %arg7[%c0_149, %c0_150, %c3_151, %c0_152, %c0_153] : memref<1x1x4x2x128xf32, #tpu.memory_space<vmem>>, vector<1x1x1x2x128xf32>
    %121 = vector.shape_cast %120 : vector<1x1x1x2x128xf32> to vector<2x128xf32>
    %122 = vector.shape_cast %119 : vector<2x128xf32> to vector<1x1x1x2x128xf32>
    tpu.vector_store %arg7[%c0_149, %c0_150, %c3_151, %c0_152, %c0_153], %122 {strides = array<i32>} : memref<1x1x4x2x128xf32, #tpu.memory_space<vmem>>, vector<1x1x1x2x128xf32>,
    return
  }
  func.func @transform_0(%arg0: i32, %arg1: i32, %arg2: i32) -> (i32, i32, i32, i32) {
    %c1_i32 = arith.constant 1 : i32
    %0 = arith.muli %arg1, %c1_i32 : i32
    %1 = arith.addi %0, %arg2 : i32
    %c0_i32 = arith.constant 0 : i32
    %c0_i32_0 = arith.constant 0 : i32
    %c0_i32_1 = arith.constant 0 : i32
    return %arg0, %c0_i32, %1, %c0_i32_0 : i32, i32, i32, i32
  }
  func.func @transform_1(%arg0: i32, %arg1: i32, %arg2: i32) -> (i32, i32, i32, i32) {
    %c1_i32 = arith.constant 1 : i32
    %0 = arith.muli %arg1, %c1_i32 : i32
    %1 = arith.addi %0, %arg2 : i32
    %c0_i32 = arith.constant 0 : i32
    %c0_i32_0 = arith.constant 0 : i32
    %c0_i32_1 = arith.constant 0 : i32
    return %arg0, %c0_i32, %1, %c0_i32_0 : i32, i32, i32, i32
  }
  func.func @transform_2(%arg0: i32, %arg1: i32, %arg2: i32) -> (i32, i32, i32, i32, i32) {
    %c0_i32 = arith.constant 0 : i32
    %c0_i32_0 = arith.constant 0 : i32
    %c0_i32_1 = arith.constant 0 : i32
    %c0_i32_2 = arith.constant 0 : i32
    return %arg0, %arg1, %c0_i32, %c0_i32_0, %c0_i32_1 : i32, i32, i32, i32, i32
  }
  func.func @transform_3(%arg0: i32, %arg1: i32, %arg2: i32) -> (i32, i32, i32, i32, i32) {
    %c0_i32 = arith.constant 0 : i32
    %c0_i32_0 = arith.constant 0 : i32
    %c0_i32_1 = arith.constant 0 : i32
    %c0_i32_2 = arith.constant 0 : i32
    return %arg0, %arg1, %c0_i32, %c0_i32_0, %c0_i32_1 : i32, i32, i32, i32, i32
  }
  func.func @transform_4(%arg0: i32, %arg1: i32, %arg2: i32) -> (i32, i32, i32, i32, i32) {
    %c0_i32 = arith.constant 0 : i32
    %c0_i32_0 = arith.constant 0 : i32
    %c0_i32_1 = arith.constant 0 : i32
    %c0_i32_2 = arith.constant 0 : i32
    return %arg0, %arg1, %c0_i32, %c0_i32_0, %c0_i32_1 : i32, i32, i32, i32, i32
  }
}

</mosaic_0001>

<bundles_post_ra>
// kernel: tpu_custom_call.1
= control target key start
LH: loop header
LB: loop body
LE: loop exit
PB: predicated region body
PF: predicated region fallthrough
CT: control target
= control target key end

     0   :  { %s1322_s0 = inlined_call_operand.hbm [shape: f32[2,4,2,128], index: 0, kind: input, shape index: {}]   ;;  %s1323_s1 = inlined_call_operand.hbm [shape: f32[2,4,2,128], index: 1, kind: input, shape index: {}]   ;;  %s1324_s2 = inlined_call_operand.hbm [shape: f32[2,1,4,2,128], index: 2, kind: output, shape index: {0}]   ;;  %s1325_s3 = inlined_call_operand.hbm [shape: f32[2,1,4,2,128], index: 3, kind: output, shape index: {1}]   ;;  %s1326_s4 = inlined_call_operand.hbm [shape: f32[2,1,4,2,128], index: 4, kind: output, shape index: {2}]  }
   0x1   :  { %1330 = sst [smem:[#allocation17_spill]] %s1322_s0 }
   0x2   :  { %10 = vsyncpa [#allocation3], 0 }
   0x3   :  { %12 = vsyncpa [#allocation3 + $0x1], 0 }
   0x4   :  { %13 = vsyncpa [#allocation6], 0 }
   0x5   :  { %15 = vsyncpa [#allocation6 + $0x1], 0 }
   0x6   :  { %16 = vsyncpa [#allocation4], 0 }
   0x7   :  { %18 = vsyncpa [#allocation4 + $0x1], 0 }
   0x8   :  { %19 = vsyncpa [#allocation9], 0 }
   0x9   :  { %21 = vsyncpa [#allocation9 + $0x1], 0  ;;  %s1049_s15 = smov 0   ;;  %s1051_s16 = smov 0  }
   0xa   :  { %s1053_s17 = smov 0   ;;  %s1055_s18 = smov 0  }
   0xb   :  { %s1057_s19 = smov 0   ;;  %s1059_s20 = smov 0  }
   0xc LB: > { %1331 = sst [smem:[#allocation15_spill]] %s1012_s19  ;;  %s1080_s21 = sadd.s32 4294967295, %s1016_s20   ;;  %s1016_s20 = sphi %s1059_s20, %s27_s20   ;;  %s1012_s19 = sphi %s1057_s19, %s1341_s19   ;;  %s1008_s18 = sphi %s1055_s18, %s1340_s18   ;;  %s1004_s17 = sphi %s1053_s17, %s1344_s17   ;;  %s1000_s16 = sphi %s1051_s16, %s1343_s16   ;;  %s996_s15 = sphi %s1049_s15, %s1342_s15  }
   0xd   : > { %s1327_s22 = sadd.s32 4294967294, %s1016_s20   ;;  %s46_s23 = sadd.s32 1, %s1012_s19 }
   0xe   : > { %s57_s24 = sadd.s32 1, %s1004_s17  ;;  %p48_p0 = scmp.ge.s32.totalorder %s46_s23, 2 }
   0xf   : > { %p64_p1 = scmp.ne.s32.totalorder %s1004_s17, %s1000_s16  ;;  %p65_p2 = scmp.eq.s32.totalorder %s1016_s20, 0 }
  0x10   : > { %p70_p3 = scmp.ne.s32.totalorder %s1000_s16, %s996_s15  ;;  %s1346_s23 = smov (%p48_p0, %s46_s23), 0 }
  0x11   : > { %1332 = sst [smem:[#allocation16_spill]] %s1346_s23  ;;  %p1092_p4 = por %p65_p2, %p64_p1 }
  0x12   : > { %p71_p5 = scmp.eq.s32.totalorder %s1080_s21, 0  ;;  %s52_s26 = ssub.s32 %s1012_s19, %s1346_s23 }
  0x13   : > { %p126_p6 = scmp.eq.s32.totalorder %s1080_s21, 1  ;;  %p55_p7 = scmp.eq.s32.totalorder %s52_s26, 0 }
  0x14   : > { %p1100_p8 = por %p71_p5, %p70_p3  ;;  %p132_p10 = scmp.eq.s32.totalorder %s1327_s22, 1 }
  0x15   : > { %p1104_p9 = por %p126_p6, %p64_p1  ;;  %p670_p12 = scmp.ge.s32.totalorder %s1016_s20, 2 }
  0x16   : > { %s1111_s29 = scalar_select %p55_p7, %s1004_s17, %s57_s24  }
  0x17   : > { %p1113_p11 = por %p132_p10, %p70_p3  ;;  %p754_p13 = scmp.lt.s32.totalorder %s1016_s20, 2 }
  0x18   : > { %s1120_s5 = sand.u32 1, %s1004_s17   ;;  %s722_s7 = sshll.u32 %s1012_s19, 3 }
  0x19   : > { %s671_s6 = sshll.u32 %s1120_s5, 3  ;;  %s1337_s0 = sld [smem:[#allocation17_spill]] }
  0x1a   : > { %s212_s11 = scalar_lea.vmem [#allocation2], %s671_s6  ;;  %p1129_p0 = pnand %p754_p13, %p1092_p4 }
  0x1b   : > { %s222_s12 = sshll.u32 %s212_s11, 4  ;;  %p677_p1 = scmp.ge.s32.totalorder %s1016_s20, 1  ;;  %s223_s12 = int_to_ptr.vmem [resolvable:$true] %s222_s12 }
  0x1c   : > { %s209_s24 = scalar_lea.sflag [#allocation3], %s1120_s5  ;;  %s1018_s26 = smov 32  }
  0x1d   : > { %s1019_s22 = smov 2   ;;  %p254_p2 = scmp.lt.s32.totalorder %s1016_s20, 3 }
  0x1e   : > { %s236_s25 = scalar_lea.vmem [#allocation5], %s671_s6  ;;  %s233_s23 = scalar_lea.sflag [#allocation6], %s1120_s5 }
  0x1f   : > { %s219_s10 = scalar_lea.hbm %s1337_s0, %s722_s7  ;;  %p255_p3 = pnand %p677_p1, %p254_p2 }
  0x20   : > { %s220_s13 = sshll.u32 %s219_s10, 4  ;;  %s243_s10 = scalar_lea.hbm %s1323_s1, %s722_s7  ;;  %s221_s13 = int_to_ptr.hbm [resolvable:$true] %s220_s13 }
  0x21   : > { %740 = dma.hbm_to_vmem [thread:$0]  (!%p1129_p0), %s221_s13, 128, %s223_s12, %s209_s24, %s1018_s26, %s1018_s26, %s1019_s22  }
  0x22   : > { %s244_s11 = sshll.u32 %s243_s10, 4  ;;  %s246_s0 = sshll.u32 %s236_s25, 4  ;;  %s245_s11 = int_to_ptr.hbm [resolvable:$true] %s244_s11  ;;  %s247_s0 = int_to_ptr.vmem [resolvable:$true] %s246_s0 }
  0x23   : > { %743 = dma.hbm_to_vmem [thread:$0]  (!%p1129_p0), %s245_s11, 128, %s247_s0, %s233_s23, %s1018_s26, %s1018_s26, %s1019_s22  }
  0x24   : > { %258 = sbr.rel (%p255_p3) target bundleno = 101 (0x65), region = 28  ;;  %s1145_s19 = sand.u32 (!%p255_p3), 1, %s1000_s16  }
  0x25   : > { %s678_s12 = sshll.u32 (!%p255_p3), %s1145_s19, 3  ;;  %s261_s13 = scalar_lea.sflag (!%p255_p3), [#allocation3], %s1145_s19 }
  0x26   : > { %s264_s24 = scalar_lea.vmem (!%p255_p3), [#allocation2], %s678_s12 }
  0x29   : > { %979 = dma.done.wait (%p1100_p8), %s261_s13, 128  }
  0x2a   : > { %981 = vsyncadd (%p1100_p8), %s261_s13, 4294967168  ;;  %s271_s5 = scalar_lea.sflag [#allocation6], %s1145_s19  ;;  %s1154_s6 = scalar_lea.vmem [#allocation5], %s678_s12 }
  0x2b   : > { %983 = dma.done.wait (%p1100_p8), %s271_s5, 128  }
  0x2c   : > { %985 = vsyncadd (%p1100_p8), %s271_s5, 4294967168  ;;  %s1160_s0 = scalar_lea.vmem [#allocation8], %s678_s12  ;;  %v1020_v0 = vmov 0.0   ;;  %s1166_s22 = scalar_lea.vmem [#allocation7], %s678_s12  ;;  %v333_v1 = vld [vmem:[%s264_s24] sm:$0x3] }
  0x2d   : > { %325 = vst [vmem:[%s1160_s0] sm:$0x3] %v1020_v0  ;;  %v683_v2 = vld [vmem:[%s264_s24 + $0x2] sm:$0x3]  ;;  %v684_v3 = vld [vmem:[%s264_s24 + $0x4] sm:$0x3]  ;;  %s1172_s23 = scalar_lea.vmem [#allocation10], %s678_s12 }
  0x2e   : > { %326 = vst [vmem:[%s1160_s0 + $0x2] sm:$0x3] %v1020_v0  ;;  %vm336_vm0 = vcmp.gt.f32.partialorder %v683_v2, %v333_v1  ;;  %v1021_v5 = vmov 0   ;;  %v685_v7 = vld [vmem:[%s264_s24 + $0x6] sm:$0x3]  ;;  %s421_s27 = sand.u32 1, %s1080_s21  }
  0x2f   : > { %327 = vst [vmem:[%s1160_s0 + $0x4] sm:$0x3] %v1020_v0  ;;  %v337_v4 = vsel %vm336_vm0, %v683_v2, %v333_v1  ;;  %v338_v6 = vsel %vm336_vm0, 1, %v1021_v5  ;;  %v351_v15 = vld [vmem:[%s1154_s6] sm:$0x3]  ;;  %s1193_s7 = sshll.u32 %s1008_s18, 3 }
  0x30   : > { %328 = vst [vmem:[%s1160_s0 + $0x6] sm:$0x3] %v1020_v0  ;;  %vm341_vm1 = vcmp.gt.f32.partialorder %v684_v3, %v337_v4  ;;  %v688_v16 = vld [vmem:[%s1154_s6 + $0x2] sm:$0x3]  ;;  %v696_v21 = vld [vmem:[%s1154_s6 + $0x4] sm:$0x3]  ;;  %s459_s26 = scalar_lea.hbm %s1325_s3, %s1193_s7  ;;  %s440_s11 = scalar_lea.hbm %s1324_s2, %s1193_s7 }
  0x31   : > { %321 = vst [vmem:[%s1166_s22] sm:$0x3] %v1020_v0  ;;  %v342_v8 = vsel %vm341_vm1, %v684_v3, %v337_v4  ;;  %v343_v9 = vsel %vm341_vm1, 2, %v338_v6  ;;  %v704_v31 = vld [vmem:[%s1154_s6 + $0x6] sm:$0x3]  ;;  %s460_s8 = sshll.u32 %s1160_s0, 4  ;;  %s478_s13 = scalar_lea.hbm %s1326_s4, %s1193_s7  ;;  %s1218_s8 = int_to_ptr.vmem [resolvable:$true] %s460_s8 }
  0x32   : > { %322 = vst [vmem:[%s1166_s22 + $0x2] sm:$0x3] %v1020_v0  ;;  %vm346_vm2 = vcmp.gt.f32.partialorder %v685_v7, %v342_v8  ;;  %s1220_s24 = sshll.u32 %s459_s26, 4  ;;  %s441_s5 = sshll.u32 %s1166_s22, 4  ;;  %s463_s24 = int_to_ptr.hbm [resolvable:$true] %s1220_s24  ;;  %s1233_s5 = int_to_ptr.vmem [resolvable:$true] %s441_s5 }
  0x33   : > { %323 = vst [vmem:[%s1166_s22 + $0x4] sm:$0x3] %v1020_v0  ;;  %v347_v13 = vsel %vm346_vm2, 3, %v343_v9  ;;  %s1224_s6 = sshll.u32 %s440_s11, 4  ;;  %s479_s7 = sshll.u32 %s1172_s23, 4  ;;  %s444_s6 = int_to_ptr.hbm [resolvable:$true] %s1224_s6  ;;  %s1237_s7 = int_to_ptr.vmem [resolvable:$true] %s479_s7 }
  0x34   : > { %324 = vst [vmem:[%s1166_s22 + $0x6] sm:$0x3] %v1020_v0  ;;  %v356_v10 = vld [vmem:[%s1160_s0] sm:$0x3]  ;;  %vm348_vm3 = vcmp.eq.s32.totalorder %v347_v13, 0  ;;  %vm362_vm4 = vcmp.eq.s32.totalorder %v347_v13, 1 }
  0x35   : > { %329 = vst [vmem:[%s1172_s23] sm:$0x3] %v1020_v0  ;;  %v691_v11 = vld [vmem:[%s1160_s0 + $0x2] sm:$0x3]  ;;  %vm380_vm5 = vcmp.eq.s32.totalorder %v347_v13, 2  ;;  %vm398_vm6 = vcmp.eq.s32.totalorder %v347_v13, 3  ;;  %v686_v17 = vsel %vm348_vm3, 1.0, %v1020_v0 }
  0x36   : > { %330 = vst [vmem:[%s1172_s23 + $0x2] sm:$0x3] %v1020_v0  ;;  %v699_v12 = vld [vmem:[%s1160_s0 + $0x4] sm:$0x3]  ;;  %v687_v18 = vsel %vm362_vm4, 1.0, %v1020_v0  ;;  %v695_v19 = vsel %vm380_vm5, 1.0, %v1020_v0  ;;  %v357_v22 = vadd.f32 %v686_v17, %v356_v10  ;;  %v353_v28 = vmul.f32 %v686_v17, %v351_v15 }
  0x37   : > { %331 = vst [vmem:[%s1172_s23 + $0x4] sm:$0x3] %v1020_v0  ;;  %v707_v14 = vld [vmem:[%s1160_s0 + $0x6] sm:$0x3]  ;;  %v703_v20 = vsel %vm398_vm6, 1.0, %v1020_v0  ;;  %v374_v23 = vadd.f32 %v691_v11, %v687_v18  ;;  %v392_v24 = vadd.f32 %v699_v12, %v695_v19  ;;  %v369_v30 = vmul.f32 %v688_v16, %v687_v18  ;;  %s1242_s18 = scalar_lea.sflag [#allocation9], %s421_s27 }
  0x38   : > { %332 = vst [vmem:[%s1172_s23 + $0x6] sm:$0x3] %v1020_v0  ;;  %v352_v25 = vld [vmem:[%s1166_s22] sm:$0x3]  ;;  %v410_v27 = vadd.f32 %v707_v14, %v703_v20  ;;  %v387_v33 = vmul.f32 %v696_v21, %v695_v19  ;;  %v405_v39 = vmul.f32 %v704_v31, %v703_v20  ;;  %s884_s14 = sshra.s32 %s463_s24, 4  ;;  %s885_s14 = int_to_ptr.hbm [resolvable:$true] %s884_s14 }
  0x39   : > { %v689_v29 = vld [vmem:[%s1166_s22 + $0x2] sm:$0x3]  ;;  %358 = vst [vmem:[%s1160_s0] sm:$0x3] %v357_v22  ;;  %v354_v34 = vadd.f32 %v353_v28, %v352_v25  ;;  %s886_s26 = scalar_lea.hbm %s885_s14, 8  ;;  %p891_p7 = scmp.lt.s32.totalorder %s885_s14, %s1325_s3 }
  0x3a   : > { %692 = vst [vmem:[%s1160_s0 + $0x2] sm:$0x3] %v374_v23  ;;  %v697_v36 = vld [vmem:[%s1166_s22 + $0x4] sm:$0x3]  ;;  %v370_v37 = vadd.f32 %v689_v29, %v369_v30  ;;  %p887_p4 = scmp.ne.s32.totalorder %s885_s14, %s886_s26 }
  0x3b   : > { %700 = vst [vmem:[%s1160_s0 + $0x4] sm:$0x3] %v392_v24  ;;  %v705_v41 = vld [vmem:[%s1166_s22 + $0x6] sm:$0x3]  ;;  %v388_v42 = vadd.f32 %v697_v36, %v387_v33 }
  0x3c   : > { %v359_v26 = vld [vmem:[%s1172_s23] sm:$0x3]  ;;  %708 = vst [vmem:[%s1160_s0 + $0x6] sm:$0x3] %v410_v27  ;;  %v406_v45 = vadd.f32 %v705_v41, %v405_v39  ;;  %s1227_s0 = sshll.u32 %s478_s13, 4  ;;  %p888_p5 = pnand %p887_p4, %p1104_p9  ;;  %s482_s0 = int_to_ptr.hbm [resolvable:$true] %s1227_s0 }
  0x3d   : > { %v693_v32 = vld [vmem:[%s1172_s23 + $0x2] sm:$0x3]  ;;  %v360_v35 = vadd.f32 %v359_v26, %v351_v15  ;;  %355 = vst [vmem:[%s1166_s22] sm:$0x3] %v354_v34 }
  0x3e   : > { %v701_v38 = vld [vmem:[%s1172_s23 + $0x4] sm:$0x3]  ;;  %v378_v40 = vadd.f32 %v693_v32, %v688_v16  ;;  %690 = vst [vmem:[%s1166_s22 + $0x2] sm:$0x3] %v370_v37  ;;  %p889_p6 = pneg %p888_p5 }
  0x3f   : > { %v709_v43 = vld [vmem:[%s1172_s23 + $0x6] sm:$0x3]  ;;  %361 = vst [vmem:[%s1172_s23] sm:$0x3] %v360_v35  ;;  %v396_v44 = vadd.f32 %v701_v38, %v696_v21 }
  0x40   : > { %694 = vst [vmem:[%s1172_s23 + $0x2] sm:$0x3] %v378_v40  ;;  %v414_v46 = vadd.f32 %v709_v43, %v704_v31 }
  0x41   : > { %698 = vst [vmem:[%s1166_s22 + $0x4] sm:$0x3] %v388_v42 }
  0x42   : > { %702 = vst [vmem:[%s1172_s23 + $0x4] sm:$0x3] %v396_v44 }
  0x43   : > { %706 = vst [vmem:[%s1166_s22 + $0x6] sm:$0x3] %v406_v45  ;;  %s890_s22 = scalar_lea.hbm %s1325_s3, 16 }
  0x44   : > { %710 = vst [vmem:[%s1172_s23 + $0x6] sm:$0x3] %v414_v46  ;;  %p892_p8 = scmp.lt.s32.totalorder %s890_s22, %s886_s26 }
  0x46   : > { %p893_p10 = por %p892_p8, %p891_p7 }
  0x48   : > { %p894_p13 = pnand %p893_p10, %p889_p6 }
  0x4a   : > { %897 = shalt.err (!%p894_p13)
}
  0x4b   : > { %s1022_s21 = smov 32   ;;  %s1023_s23 = smov 2  }
  0x4c   : > { %732 = dma.vmem_to_hbm [thread:$0]  (%p1104_p9), %s1218_s8, 128, %s463_s24, %s1242_s18, %s1022_s21, %s1022_s21, %s1023_s23  }
  0x4d   : > { %s417_s27 = scalar_lea.sflag [#allocation4], %s1145_s19  ;;  %s912_s12 = sshra.s32 %s444_s6, 4  ;;  %s913_s12 = int_to_ptr.hbm [resolvable:$true] %s912_s12 }
  0x4e   : > { %s914_s13 = scalar_lea.hbm %s913_s12, 8  ;;  %s918_s9 = scalar_lea.hbm %s1324_s2, 16 }
  0x4f   : > { %p915_p0 = scmp.ne.s32.totalorder %s913_s12, %s914_s13  ;;  %p919_p3 = scmp.lt.s32.totalorder %s913_s12, %s1324_s2 }
  0x50   : > { %p920_p4 = scmp.lt.s32.totalorder %s918_s9, %s914_s13 }
  0x51   : > { %p916_p1 = pnand %p915_p0, %p1104_p9 }
  0x52   : > { %p921_p5 = por %p920_p4, %p919_p3 }
  0x53   : > { %p917_p2 = pneg %p916_p1 }
  0x55   : > { %p922_p6 = pnand %p921_p5, %p917_p2 }
  0x57   : > { %925 = shalt.err (!%p922_p6)
}
  0x58   : > { %731 = dma.vmem_to_hbm [thread:$0]  (%p1104_p9), %s1233_s5, 128, %s444_s6, %s417_s27, %s1022_s21, %s1022_s21, %s1023_s23  }
  0x59   : > { %s940_s19 = sshra.s32 %s482_s0, 4  ;;  %s946_s25 = scalar_lea.hbm %s1326_s4, 16  ;;  %s941_s19 = int_to_ptr.hbm [resolvable:$true] %s940_s19 }
  0x5a   : > { %s942_s8 = scalar_lea.hbm %s941_s19, 8  ;;  %p947_p13 = scmp.lt.s32.totalorder %s941_s19, %s1326_s4 }
  0x5b   : > { %p943_p7 = scmp.ne.s32.totalorder %s941_s19, %s942_s8  ;;  %p948_p0 = scmp.lt.s32.totalorder %s946_s25, %s942_s8 }
  0x5d   : > { %p944_p8 = pnand %p943_p7, %p1104_p9  ;;  %p949_p1 = por %p948_p0, %p947_p13 }
  0x5f   : > { %p945_p10 = pneg %p944_p8 }
  0x61   : > { %p950_p2 = pnand %p949_p1, %p945_p10 }
  0x63   : > { %953 = shalt.err (!%p950_p2)
}
  0x64   : > { %733 = dma.vmem_to_hbm [thread:$0]  (%p1104_p9), %s1237_s7, 128, %s482_s0, %s1242_s18, %s1022_s21, %s1022_s21, %s1023_s23  }
  0x65 PF: > { %s496_s5 = sand.u32 1, %s996_s15   ;;  %p745_p3 = pnand %p670_p12, %p1113_p11 }
  0x66   : > { %s497_s6 = scalar_lea.sflag [#allocation4], %s496_s5 }
  0x67   : > { %p746_p4 = pneg %p745_p3 }
  0x69   : > { %987 = dma.done.wait (%p746_p4), %s497_s6, 128  }
  0x6a   : > { %989 = vsyncadd (%p746_p4), %s497_s6, 4294967168  ;;  %s1339_s28 = sadd.s32 4294967294, %s1016_s20  }
  0x6b   : > { %s506_s27 = sand.u32 1, %s1339_s28  }
  0x6c   : > { %s507_s14 = scalar_lea.sflag [#allocation9], %s506_s27 }
  0x6d   : > { %991 = dma.done.wait (%p746_p4), %s507_s14, 256  }
  0x6e   : > { %993 = vsyncadd (%p746_p4), %s507_s14, 4294967040  ;;  %s27_s20 = sadd.s32 1, %s1016_s20   ;;  %s1340_s18 = sld [smem:[#allocation15_spill]] }
  0x6f   : > { %p24_p9 = scmp.ge.s32.totalorder %s27_s20, 4   ;;  %s1341_s19 = sld [smem:[#allocation16_spill]] }
  0x70   : > { %s1342_s15 = smov %s1000_s16  ;;  %s1343_s16 = smov %s1004_s17 }
  0x71   : > { %s1344_s17 = smov %s1111_s29  ;;  %26 = sbr.rel (!%p24_p9) target bundleno = 12 (0xc), region = 137 }
  0x76   :  { %523 = vsyncpa [#allocation3], 1 }
  0x77   :  { %525 = vsyncpa [#allocation3 + $0x1], 1 }
  0x78   :  { %526 = vsyncpa [#allocation6], 1 }
  0x79   :  { %528 = vsyncpa [#allocation6 + $0x1], 1 }
  0x7a   :  { %529 = vsyncpa [#allocation4], 1 }
  0x7b   :  { %531 = vsyncpa [#allocation4 + $0x1], 1 }
  0x7c   :  { %532 = vsyncpa [#allocation9], 1 }
  0x7d   :  { %534 = vsyncpa [#allocation9 + $0x1], 1 }

</bundles_post_ra>
